<compile_context>
chip_gen: v7x
topology: tpu7x:2x2x1
jax: 0.10.0
libtpu: 0.0.40
codegen_flags: <defaults>
</compile_context>

<pallas_src>
import math
import numpy as np
import jax
import jax.numpy as jnp
from jax.experimental import pallas as pl
from jax.experimental.pallas import tpu as pltpu

# ---------------- model hyper-params (synthetic, Mamba-style defaults) ----------------
B = 2          # batch
D = 32         # model dim
EXPAND = 2
D_INNER = EXPAND * D          # 64
D_STATE = 16
D_CONV = 4
DT_RANK = math.ceil(D / 16)   # 2
EPS = 1e-5                    # nn.LayerNorm default

BD = B * D                    # 64   (flat hidden width)
BDI = B * D_INNER             # 128  (flat inner width -> exactly one lane tile)
N_BC = 2 * D_STATE            # 32   (B and C projections per batch element)

# ---- row layout of the packed "misc" constant block (rows aligned to 8) ----
R_A = 0                       # rows [0, 16)   : -exp(A_log).T tiled over batch       (16, 128)
R_CONVW = 16                  # rows [16, 20)  : depthwise conv weights, batch tiled  (4, 128)
R_VEC = 24                    # rows [24, 32)  : packed 1-row vectors                 (8, 128)
V_NORM_W, V_NORM_B, V_CONV_B, V_DT_B, V_DPARAM = 0, 1, 2, 3, 4
R_SEL = 32                    # rows [32, 34)  : batch-block selector                 (2, 128)
R_MAVG = 40                   # rows [40, 104) : block-mean matrix (cols [0, 64))     (64, 64)
MISC_ROWS = R_MAVG + BD       # 104


def rlblock_kernel(hs_ref, res_ref, conv_ref, ssm_ref,
                   w_in_ref, w_xdb_ref, w_out_ref, misc_ref,
                   out_ref, out_conv_ref, out_ssm_ref):
    f32 = jnp.float32
    hi = jax.lax.Precision.HIGHEST

    # Read the (aliased) state refs exactly once, before any store, and only use the values.
    conv_prev = conv_ref[...]                                  # (D_CONV, BDI)
    ssm_prev = ssm_ref[...]                                    # (D_STATE, BDI)

    vec = misc_ref[R_VEC:R_VEC + 8, :]                         # packed 1-row params

    # ---- Add + LayerNorm on the flat (1, B*D) row ---------------------------------
    # Per-batch mean and E[x^2] from a single stacked matmul with the block-mean matrix.
    residual = hs_ref[...] + res_ref[...]                      # (1, BD)
    mavg = misc_ref[R_MAVG:R_MAVG + BD, 0:BD]                  # (BD, BD)
    stacked = jnp.concatenate([residual, residual * residual], axis=0)      # (2, BD)
    mom = jnp.dot(stacked, mavg, precision=hi, preferred_element_type=f32)  # (2, BD)
    mean = mom[0:1, :]
    var = mom[1:2, :] - mean * mean
    h = (residual - mean) * jax.lax.rsqrt(var + EPS)
    h = h * vec[V_NORM_W:V_NORM_W + 1, 0:BD] + vec[V_NORM_B:V_NORM_B + 1, 0:BD]

    # ---- in_proj (batch-block-diagonal, pre-transposed): (1,BD) @ (BD, 2*BDI) ----
    xz = jnp.dot(h, w_in_ref[...], preferred_element_type=f32)  # (1, 2*BDI)
    x_flat = xz[:, :BDI]                                        # (1, BDI)
    z_flat = xz[:, BDI:]                                        # (1, BDI)

    # ---- causal conv1d single step: unrolled FMAs on flat rows, direct state stores ----
    w_conv = misc_ref[R_CONVW:R_CONVW + D_CONV, :]              # (D_CONV, BDI)
    xc = x_flat * w_conv[D_CONV - 1:D_CONV, :] + vec[V_CONV_B:V_CONV_B + 1, :]
    for k in range(D_CONV - 1):                                 # static unroll
        xc = xc + conv_prev[k + 1:k + 2, :] * w_conv[k:k + 1, :]
    xc = xc * jax.nn.sigmoid(xc)                                # SiLU
    out_conv_ref[0:D_CONV - 1, :] = conv_prev[1:D_CONV, :]      # shifted old state
    out_conv_ref[D_CONV - 1:D_CONV, :] = x_flat                 # newest column

    # ---- fused x_proj + dt_proj (block-diagonal): (1,BDI) @ (BDI, BDI + B*2*D_STATE) ----
    xdb = jnp.dot(xc, w_xdb_ref[...], preferred_element_type=f32)
    dt = jax.nn.softplus(xdb[:, :BDI] + vec[V_DT_B:V_DT_B + 1, :])   # (1, BDI)
    bc = xdb[:, BDI:]                                           # (1, B*2*D_STATE) = [B0 C0 B1 C1]

    # Broadcast per-batch (B, C) vectors across their 64-lane batch blocks via selector matmul.
    bc2 = jnp.concatenate(
        [bc[:, b * N_BC:(b + 1) * N_BC] for b in range(B)], axis=0)   # (B, 2*D_STATE)
    sel = misc_ref[R_SEL:R_SEL + B, :]                          # (B, BDI) 0/1 block selector
    bc_bcast = jnp.einsum("bs,bl->sl", bc2, sel,
                          precision=hi, preferred_element_type=f32)   # (2*D_STATE, BDI)
    b_bc = bc_bcast[:D_STATE, :]                                # (D_STATE, BDI)
    c_bc = bc_bcast[D_STATE:, :]                                # (D_STATE, BDI)

    # ---- selective-SSM state update, fully lane-dense (D_STATE, B*D_INNER) ----
    a_t = misc_ref[R_A:R_A + D_STATE, :]                        # = -exp(A_log).T, batch tiled
    d_a = jnp.exp(dt * a_t)                                     # (D_STATE, BDI)
    new_ssm = ssm_prev * d_a + (xc * dt) * b_bc
    out_ssm_ref[...] = new_ssm                                  # dense unmasked store
    y = jnp.sum(new_ssm * c_bc, axis=0, keepdims=True)          # (1, BDI) sublane reduce
    y = y + vec[V_DPARAM:V_DPARAM + 1, :] * xc
    y = y * (z_flat * jax.nn.sigmoid(z_flat))                   # gate with SiLU(z)

    # ---- out_proj (block-diagonal, pre-transposed): (1,BDI) @ (BDI, BD) ----
    out_hr = jnp.dot(y, w_out_ref[...], preferred_element_type=f32)   # (1, BD)
    # pack [hidden_out | residual] into one lane-dense (1, 128) row -> single unmasked store
    out_ref[...] = jnp.concatenate([out_hr, residual], axis=-1)


def rlblock_step(hs, res, conv_flat, ssm_flat, prepared):
    """hs/res: (B, D). conv_flat: (D_CONV, B*D_INNER). ssm_flat: (D_STATE, B*D_INNER)."""
    w_in_big, w_xdb_big, w_out_big, misc = prepared
    vmem = pl.BlockSpec(memory_space=pltpu.MemorySpace.VMEM)
    out_shapes = (
        jax.ShapeDtypeStruct((1, 2 * BD), jnp.float32),           # [hidden_out | residual]
        jax.ShapeDtypeStruct((D_CONV, BDI), jnp.float32),         # new conv_state (aliased)
        jax.ShapeDtypeStruct((D_STATE, BDI), jnp.float32),        # new ssm_state (aliased)
    )
    combined, new_conv, new_ssm = pl.pallas_call(
        rlblock_kernel,
        out_shape=out_shapes,
        in_specs=[vmem] * 8,
        out_specs=(vmem, vmem, vmem),
        input_output_aliases={2: 1, 3: 2},                        # in-place state update
    )(hs.reshape(1, BD), res.reshape(1, BD), conv_flat, ssm_flat,
      w_in_big, w_xdb_big, w_out_big, misc)
    out_hs = combined[0, :BD].reshape(B, D)
    out_res = combined[0, BD:].reshape(B, D)
    return out_hs, out_res, new_conv, new_ssm


# ---------------- param prep: all constant re-layout work happens once, outside the kernel ----
def prepare_params(params):
    (norm_w, norm_b, in_proj_w, conv_w, conv_b, x_proj_w,
     dt_proj_w, dt_proj_b, A_log, D_param, out_proj_w) = params

    # in_proj: block-diag over batch, columns arranged [x_b0 | x_b1 | z_b0 | z_b1]
    w_x = in_proj_w[:D_INNER].T                                  # (D, D_INNER)
    w_z = in_proj_w[D_INNER:].T                                  # (D, D_INNER)
    w_in_big = jnp.zeros((BD, 2 * BDI), jnp.float32)
    for b in range(B):
        w_in_big = w_in_big.at[b * D:(b + 1) * D, b * D_INNER:(b + 1) * D_INNER].set(w_x)
        w_in_big = w_in_big.at[b * D:(b + 1) * D,
                               BDI + b * D_INNER:BDI + (b + 1) * D_INNER].set(w_z)

    # x_proj with dt_proj folded in, block-diag over batch; columns [dt (BDI) | B0 C0 B1 C1]
    w_dt_fused = x_proj_w[:DT_RANK].T @ dt_proj_w.T              # (D_INNER, D_INNER)
    w_bc = x_proj_w[DT_RANK:].T                                  # (D_INNER, 2*D_STATE)
    w_xdb_big = jnp.zeros((BDI, BDI + B * N_BC), jnp.float32)
    for b in range(B):
        w_xdb_big = w_xdb_big.at[b * D_INNER:(b + 1) * D_INNER,
                                 b * D_INNER:(b + 1) * D_INNER].set(w_dt_fused)
        w_xdb_big = w_xdb_big.at[b * D_INNER:(b + 1) * D_INNER,
                                 BDI + b * N_BC:BDI + (b + 1) * N_BC].set(w_bc)

    # out_proj: block-diag over batch, pre-transposed
    w_out_t = out_proj_w.T                                       # (D_INNER, D)
    w_out_big = jnp.zeros((BDI, BD), jnp.float32)
    for b in range(B):
        w_out_big = w_out_big.at[b * D_INNER:(b + 1) * D_INNER, b * D:(b + 1) * D].set(w_out_t)

    # packed misc constants (single DMA'd input)
    misc = jnp.zeros((MISC_ROWS, BDI), jnp.float32)
    a_t = jnp.tile((-jnp.exp(A_log)).T, (1, B))                  # hoisted -exp(A_log), tiled
    misc = misc.at[R_A:R_A + D_STATE, :].set(a_t)
    misc = misc.at[R_CONVW:R_CONVW + D_CONV, :].set(jnp.tile(conv_w, (1, B)))
    misc = misc.at[R_VEC + V_NORM_W, :BD].set(jnp.tile(norm_w.reshape(-1), B))
    misc = misc.at[R_VEC + V_NORM_B, :BD].set(jnp.tile(norm_b.reshape(-1), B))
    misc = misc.at[R_VEC + V_CONV_B, :].set(jnp.tile(conv_b.reshape(-1), B))
    misc = misc.at[R_VEC + V_DT_B, :].set(jnp.tile(dt_proj_b.reshape(-1), B))
    misc = misc.at[R_VEC + V_DPARAM, :].set(jnp.tile(D_param.reshape(-1), B))
    sel = jnp.zeros((B, BDI), jnp.float32)
    for b in range(B):
        sel = sel.at[b, b * D_INNER:(b + 1) * D_INNER].set(1.0)
    misc = misc.at[R_SEL:R_SEL + B, :].set(sel)
    blk = jnp.arange(BD) // D
    mavg = jnp.where(blk[:, None] == blk[None, :], 1.0 / D, 0.0).astype(jnp.float32)
    misc = misc.at[R_MAVG:R_MAVG + BD, :BD].set(mavg)

    return w_in_big, w_xdb_big, w_out_big, misc


# ---------------- pure-JAX reference (original PyTorch layouts) ----------------
def rlblock_ref(hs, res, conv_state, ssm_state, params):
    (norm_w, norm_b, in_proj_w, conv_w, conv_b, x_proj_w,
     dt_proj_w, dt_proj_b, A_log, D_param, out_proj_w) = params
    residual = hs + res
    mean = residual.mean(-1, keepdims=True)
    var = ((residual - mean) ** 2).mean(-1, keepdims=True)
    h = (residual - mean) / jnp.sqrt(var + EPS) * norm_w + norm_b
    xz = h @ in_proj_w.T
    x, z = xz[:, :D_INNER], xz[:, D_INNER:]
    new_conv = jnp.concatenate([conv_state[1:], x[None]], axis=0)
    xc = (new_conv * conv_w[:, None, :]).sum(0) + conv_b
    xc = xc * jax.nn.sigmoid(xc)
    x_db = xc @ x_proj_w.T
    dt_low = x_db[:, :DT_RANK]
    Bm = x_db[:, DT_RANK:DT_RANK + D_STATE]
    Cm = x_db[:, DT_RANK + D_STATE:]
    dt = jax.nn.softplus(dt_low @ dt_proj_w.T + dt_proj_b)
    A = -jnp.exp(A_log)
    dA = jnp.exp(dt[:, :, None] * A[None])
    dB = dt[:, :, None] * Bm[:, None, :]
    new_ssm = ssm_state * dA + xc[:, :, None] * dB
    y = (new_ssm * Cm[:, None, :]).sum(-1) + D_param * xc
    y = y * (z * jax.nn.sigmoid(z))
    out = y @ out_proj_w.T
    return out, residual, new_conv, new_ssm


def make_params(key):
    ks = jax.random.split(key, 8)
    # non-trivial norm params so the LayerNorm affine path is actually exercised
    norm_w = 1.0 + 0.1 * jax.random.normal(ks[6], (1, D), jnp.float32)
    norm_b = 0.05 * jax.random.normal(ks[7], (1, D), jnp.float32)
    in_proj_w = 0.05 * jax.random.normal(ks[0], (2 * D_INNER, D), jnp.float32)
    conv_w = 0.1 * jax.random.normal(ks[1], (D_CONV, D_INNER), jnp.float32)
    conv_b = 0.01 * jax.random.normal(ks[2], (1, D_INNER), jnp.float32)
    x_proj_w = 0.05 * jax.random.normal(ks[3], (DT_RANK + 2 * D_STATE, D_INNER), jnp.float32)
    dt_proj_w = 0.1 * jax.random.normal(ks[4], (D_INNER, DT_RANK), jnp.float32)
    dt_proj_b = jnp.full((1, D_INNER), -2.0, jnp.float32)
    A_log = jnp.log(jnp.broadcast_to(jnp.arange(1, D_STATE + 1, dtype=jnp.float32),
                                     (D_INNER, D_STATE)))
    D_param = jnp.ones((1, D_INNER), jnp.float32)
    out_proj_w = 0.05 * jax.random.normal(ks[5], (D, D_INNER), jnp.float32)
    return (norm_w, norm_b, in_proj_w, conv_w, conv_b, x_proj_w,
            dt_proj_w, dt_proj_b, A_log, D_param, out_proj_w)


if __name__ == "__main__":
    key = jax.random.PRNGKey(0)
    k_hs, k_res, k_conv, k_ssm, k_par = jax.random.split(key, 5)
    hs = jax.random.normal(k_hs, (B, D), jnp.float32)
    res = jax.random.normal(k_res, (B, D), jnp.float32)
    conv_state = jax.random.normal(k_conv, (D_CONV, B, D_INNER), jnp.float32)
    ssm_state = jax.random.normal(k_ssm, (B, D_INNER, D_STATE), jnp.float32)
    params = make_params(k_par)
    prepared = prepare_params(params)

    # convert states to the lane-dense kernel layout (done once; steady-state keeps this layout)
    conv_flat = conv_state.reshape(D_CONV, BDI)
    ssm_flat = jnp.transpose(ssm_state, (2, 0, 1)).reshape(D_STATE, BDI)

    step = jax.jit(rlblock_step)
    out_hs, out_res, new_conv_flat, new_ssm_flat = jax.block_until_ready(
        step(hs, res, conv_flat, ssm_flat, prepared))

    # convert new states back to the PyTorch layout for checking
    new_conv = np.asarray(new_conv_flat).reshape(D_CONV, B, D_INNER)
    new_ssm = np.transpose(np.asarray(new_ssm_flat).reshape(D_STATE, B, D_INNER), (1, 2, 0))

    ref_hs, ref_res, ref_conv, ref_ssm = rlblock_ref(hs, res, conv_state, ssm_state, params)
    np.testing.assert_allclose(np.asarray(out_hs), np.asarray(ref_hs), rtol=2e-2, atol=2e-2)
    np.testing.assert_allclose(np.asarray(out_res), np.asarray(ref_res), rtol=2e-2, atol=2e-2)
    np.testing.assert_allclose(new_conv, np.asarray(ref_conv), rtol=2e-2, atol=2e-2)
    np.testing.assert_allclose(new_ssm, np.asarray(ref_ssm), rtol=2e-2, atol=2e-2)

    print("KERNEL_OK")
</pallas_src>

<mosaic_0001>
module attributes {stable_mosaic.version = 11 : i64} {
  func.func @rlblock_kernel(%arg0: memref<1x64xf32, #tpu.memory_space<vmem>>, %arg1: memref<1x64xf32, #tpu.memory_space<vmem>>, %arg2: memref<4x128xf32, #tpu.memory_space<vmem>>, %arg3: memref<16x128xf32, #tpu.memory_space<vmem>>, %arg4: memref<64x256xf32, #tpu.memory_space<vmem>>, %arg5: memref<128x192xf32, #tpu.memory_space<vmem>>, %arg6: memref<128x64xf32, #tpu.memory_space<vmem>>, %arg7: memref<104x128xf32, #tpu.memory_space<vmem>>, %arg8: memref<1x128xf32, #tpu.memory_space<vmem>>, %arg9: memref<4x128xf32, #tpu.memory_space<vmem>>, %arg10: memref<16x128xf32, #tpu.memory_space<vmem>>) attributes {dimension_semantics = [], scalar_prefetch = 0 : i64, scratch_operands = 0 : i64, tpu.core_type = #tpu.core_type<tc>} {
    %c0 = arith.constant 0 : index
    %c0_0 = arith.constant 0 : index
    %0 = vector.load %arg2[%c0, %c0_0] : memref<4x128xf32, #tpu.memory_space<vmem>>, vector<4x128xf32>
    %c0_1 = arith.constant 0 : index
    %c0_2 = arith.constant 0 : index
    %1 = vector.load %arg3[%c0_1, %c0_2] : memref<16x128xf32, #tpu.memory_space<vmem>>, vector<16x128xf32>
    %c24 = arith.constant 24 : index
    %c0_3 = arith.constant 0 : index
    %2 = vector.load %arg7[%c24, %c0_3] : memref<104x128xf32, #tpu.memory_space<vmem>>, vector<8x128xf32>
    %c0_4 = arith.constant 0 : index
    %c0_5 = arith.constant 0 : index
    %3 = vector.load %arg0[%c0_4, %c0_5] : memref<1x64xf32, #tpu.memory_space<vmem>>, vector<1x64xf32>
    %c0_6 = arith.constant 0 : index
    %c0_7 = arith.constant 0 : index
    %4 = vector.load %arg1[%c0_6, %c0_7] : memref<1x64xf32, #tpu.memory_space<vmem>>, vector<1x64xf32>
    %5 = arith.addf %3, %4 : vector<1x64xf32>
    %c40 = arith.constant 40 : index
    %c0_8 = arith.constant 0 : index
    %6 = vector.load %arg7[%c40, %c0_8] : memref<104x128xf32, #tpu.memory_space<vmem>>, vector<64x64xf32>
    %7 = arith.mulf %5, %5 : vector<1x64xf32>
    %8 = tpu.concatenate %5, %7 in 0 : vector<1x64xf32>, vector<1x64xf32> -> vector<2x64xf32>
    %cst = arith.constant dense<0.000000e+00> : vector<2x64xf32>
    %9 = tpu.matmul %8, %6, %cst {dimension_numbers = #tpu.dot_dimension_numbers<[1], [0], [0], [1], [0, 0, 1, 1], [], []>, precision = #tpu.contract_precision<fp32>} : vector<2x64xf32>, vector<64x64xf32>, vector<2x64xf32> -> vector<2x64xf32>
    %10 = vector.extract_strided_slice %9 {offsets = [0, 0], sizes = [1, 64], strides = [1, 1]} : vector<2x64xf32> to vector<1x64xf32>
    %11 = vector.extract_strided_slice %9 {offsets = [1, 0], sizes = [1, 64], strides = [1, 1]} : vector<2x64xf32> to vector<1x64xf32>
    %12 = arith.mulf %10, %10 : vector<1x64xf32>
    %13 = arith.subf %11, %12 : vector<1x64xf32>
    %14 = arith.subf %5, %10 : vector<1x64xf32>
    %cst_9 = arith.constant 9.99999974E-6 : f32
    %15 = vector.broadcast %cst_9 : f32 to vector<1x64xf32>
    %16 = arith.addf %13, %15 : vector<1x64xf32>
    %17 = math.rsqrt %16 : vector<1x64xf32>
    %18 = arith.mulf %14, %17 : vector<1x64xf32>
    %19 = vector.extract_strided_slice %2 {offsets = [0, 0], sizes = [1, 64], strides = [1, 1]} : vector<8x128xf32> to vector<1x64xf32>
    %20 = arith.mulf %18, %19 : vector<1x64xf32>
    %21 = vector.extract_strided_slice %2 {offsets = [1, 0], sizes = [1, 64], strides = [1, 1]} : vector<8x128xf32> to vector<1x64xf32>
    %22 = arith.addf %20, %21 : vector<1x64xf32>
    %c0_10 = arith.constant 0 : index
    %c0_11 = arith.constant 0 : index
    %23 = vector.load %arg4[%c0_10, %c0_11] : memref<64x256xf32, #tpu.memory_space<vmem>>, vector<64x256xf32>
    %cst_12 = arith.constant dense<0.000000e+00> : vector<1x256xf32>
    %24 = tpu.matmul %22, %23, %cst_12 {dimension_numbers = #tpu.dot_dimension_numbers<[1], [0], [0], [1], [0, 0, 1, 1], [], []>} : vector<1x64xf32>, vector<64x256xf32>, vector<1x256xf32> -> vector<1x256xf32>
    %25 = vector.extract_strided_slice %24 {offsets = [0, 0], sizes = [1, 128], strides = [1, 1]} : vector<1x256xf32> to vector<1x128xf32>
    %26 = vector.extract_strided_slice %24 {offsets = [0, 128], sizes = [1, 128], strides = [1, 1]} : vector<1x256xf32> to vector<1x128xf32>
    %c16 = arith.constant 16 : index
    %c0_13 = arith.constant 0 : index
    %27 = vector.load %arg7[%c16, %c0_13] : memref<104x128xf32, #tpu.memory_space<vmem>>, vector<4x128xf32>
    %28 = vector.extract_strided_slice %27 {offsets = [3, 0], sizes = [1, 128], strides = [1, 1]} : vector<4x128xf32> to vector<1x128xf32>
    %29 = arith.mulf %25, %28 : vector<1x128xf32>
    %30 = vector.extract_strided_slice %2 {offsets = [2, 0], sizes = [1, 128], strides = [1, 1]} : vector<8x128xf32> to vector<1x128xf32>
    %31 = arith.addf %29, %30 : vector<1x128xf32>
    %32 = vector.extract_strided_slice %0 {offsets = [1, 0], sizes = [1, 128], strides = [1, 1]} : vector<4x128xf32> to vector<1x128xf32>
    %33 = vector.extract_strided_slice %27 {offsets = [0, 0], sizes = [1, 128], strides = [1, 1]} : vector<4x128xf32> to vector<1x128xf32>
    %34 = arith.mulf %32, %33 : vector<1x128xf32>
    %35 = arith.addf %31, %34 : vector<1x128xf32>
    %36 = vector.extract_strided_slice %0 {offsets = [2, 0], sizes = [1, 128], strides = [1, 1]} : vector<4x128xf32> to vector<1x128xf32>
    %37 = vector.extract_strided_slice %27 {offsets = [1, 0], sizes = [1, 128], strides = [1, 1]} : vector<4x128xf32> to vector<1x128xf32>
    %38 = arith.mulf %36, %37 : vector<1x128xf32>
    %39 = arith.addf %35, %38 : vector<1x128xf32>
    %40 = vector.extract_strided_slice %0 {offsets = [3, 0], sizes = [1, 128], strides = [1, 1]} : vector<4x128xf32> to vector<1x128xf32>
    %41 = vector.extract_strided_slice %27 {offsets = [2, 0], sizes = [1, 128], strides = [1, 1]} : vector<4x128xf32> to vector<1x128xf32>
    %42 = arith.mulf %40, %41 : vector<1x128xf32>
    %43 = arith.addf %39, %42 : vector<1x128xf32>
    %44 = arith.negf %43 : vector<1x128xf32>
    %45 = math.exp %44 : vector<1x128xf32>
    %cst_14 = arith.constant 1.000000e+00 : f32
    %46 = vector.broadcast %cst_14 : f32 to vector<1x128xf32>
    %47 = arith.addf %46, %45 : vector<1x128xf32>
    %48 = arith.divf %46, %47 : vector<1x128xf32>
    %49 = arith.mulf %43, %48 : vector<1x128xf32>
    %50 = vector.extract_strided_slice %0 {offsets = [1, 0], sizes = [3, 128], strides = [1, 1]} : vector<4x128xf32> to vector<3x128xf32>
    %c0_15 = arith.constant 0 : index
    %c0_16 = arith.constant 0 : index
    %51 = vector.load %arg9[%c0_15, %c0_16] : memref<4x128xf32, #tpu.memory_space<vmem>>, vector<3x128xf32>
    tpu.vector_store %arg9[%c0_15, %c0_16], %50 {strides = array<i32>} : memref<4x128xf32, #tpu.memory_space<vmem>>, vector<3x128xf32>,
    %c3 = arith.constant 3 : index
    %c0_17 = arith.constant 0 : index
    %52 = vector.load %arg9[%c3, %c0_17] : memref<4x128xf32, #tpu.memory_space<vmem>>, vector<1x128xf32>
    tpu.vector_store %arg9[%c3, %c0_17], %25 {strides = array<i32>} : memref<4x128xf32, #tpu.memory_space<vmem>>, vector<1x128xf32>,
    %c0_18 = arith.constant 0 : index
    %c0_19 = arith.constant 0 : index
    %53 = vector.load %arg5[%c0_18, %c0_19] : memref<128x192xf32, #tpu.memory_space<vmem>>, vector<128x192xf32>
    %cst_20 = arith.constant dense<0.000000e+00> : vector<1x192xf32>
    %54 = tpu.matmul %49, %53, %cst_20 {dimension_numbers = #tpu.dot_dimension_numbers<[1], [0], [0], [1], [0, 0, 1, 1], [], []>} : vector<1x128xf32>, vector<128x192xf32>, vector<1x192xf32> -> vector<1x192xf32>
    %55 = vector.extract_strided_slice %54 {offsets = [0, 0], sizes = [1, 128], strides = [1, 1]} : vector<1x192xf32> to vector<1x128xf32>
    %56 = vector.extract_strided_slice %2 {offsets = [3, 0], sizes = [1, 128], strides = [1, 1]} : vector<8x128xf32> to vector<1x128xf32>
    %57 = arith.addf %55, %56 : vector<1x128xf32>
    %cst_21 = arith.constant 0.000000e+00 : f32
    %58 = vector.broadcast %cst_21 : f32 to vector<1x128xf32>
    %59 = arith.maximumf %57, %58 : vector<1x128xf32>
    %60 = vector.broadcast %cst_21 : f32 to vector<1x128xf32>
    %61 = arith.subf %57, %60 : vector<1x128xf32>
    %62 = arith.cmpf one, %61, %61 : vector<1x128xf32>
    %63 = vector.broadcast %cst_21 : f32 to vector<1x128xf32>
    %64 = arith.addf %57, %63 : vector<1x128xf32>
    %65 = math.absf %61 : vector<1x128xf32>
    %cst_22 = arith.constant 0.000000e+00 : f32
    %66 = vector.broadcast %cst_22 : f32 to vector<1x128xf32>
    %67 = arith.subf %66, %65 : vector<1x128xf32>
    %68 = math.exp %67 : vector<1x128xf32>
    %69 = math.log1p %68 : vector<1x128xf32>
    %70 = arith.addf %59, %69 : vector<1x128xf32>
    %71 = arith.select %62, %64, %70 : vector<1x128xi1>, vector<1x128xf32>
    %72 = vector.extract_strided_slice %54 {offsets = [0, 128], sizes = [1, 64], strides = [1, 1]} : vector<1x192xf32> to vector<1x64xf32>
    %73 = vector.extract_strided_slice %72 {offsets = [0, 0], sizes = [1, 32], strides = [1, 1]} : vector<1x64xf32> to vector<1x32xf32>
    %74 = vector.extract_strided_slice %72 {offsets = [0, 32], sizes = [1, 32], strides = [1, 1]} : vector<1x64xf32> to vector<1x32xf32>
    %75 = tpu.concatenate %73, %74 in 0 : vector<1x32xf32>, vector<1x32xf32> -> vector<2x32xf32>
    %c32 = arith.constant 32 : index
    %c0_23 = arith.constant 0 : index
    %76 = vector.load %arg7[%c32, %c0_23] : memref<104x128xf32, #tpu.memory_space<vmem>>, vector<2x128xf32>
    "tpu.trace_start"() <{level = 10 : i32, message = "bs,bl->sl"}> : () -> ()
    %cst_24 = arith.constant dense<0.000000e+00> : vector<32x128xf32>
    %77 = tpu.matmul %75, %76, %cst_24 {dimension_numbers = #tpu.dot_dimension_numbers<[0], [0], [1], [1], [0, 1, 1, 1], [], []>, precision = #tpu.contract_precision<fp32>} : vector<2x32xf32>, vector<2x128xf32>, vector<32x128xf32> -> vector<32x128xf32>
    "tpu.trace_stop"() : () -> ()
    %78 = vector.extract_strided_slice %77 {offsets = [0, 0], sizes = [16, 128], strides = [1, 1]} : vector<32x128xf32> to vector<16x128xf32>
    %79 = vector.extract_strided_slice %77 {offsets = [16, 0], sizes = [16, 128], strides = [1, 1]} : vector<32x128xf32> to vector<16x128xf32>
    %c0_25 = arith.constant 0 : index
    %c0_26 = arith.constant 0 : index
    %80 = vector.load %arg7[%c0_25, %c0_26] : memref<104x128xf32, #tpu.memory_space<vmem>>, vector<16x128xf32>
    %81 = vector.broadcast %71 : vector<1x128xf32> to vector<16x128xf32>
    %82 = arith.mulf %81, %80 : vector<16x128xf32>
    %83 = math.exp %82 : vector<16x128xf32>
    %84 = arith.mulf %1, %83 : vector<16x128xf32>
    %85 = arith.mulf %49, %71 : vector<1x128xf32>
    %86 = vector.broadcast %85 : vector<1x128xf32> to vector<16x128xf32>
    %87 = arith.mulf %86, %78 : vector<16x128xf32>
    %88 = arith.addf %84, %87 : vector<16x128xf32>
    %c0_27 = arith.constant 0 : index
    %c0_28 = arith.constant 0 : index
    %89 = vector.load %arg10[%c0_27, %c0_28] : memref<16x128xf32, #tpu.memory_space<vmem>>, vector<16x128xf32>
    tpu.vector_store %arg10[%c0_27, %c0_28], %88 {strides = array<i32>} : memref<16x128xf32, #tpu.memory_space<vmem>>, vector<16x128xf32>,
    %90 = arith.mulf %88, %79 : vector<16x128xf32>
    %cst_29 = arith.constant dense<0.000000e+00> : vector<128xf32>
    %91 = vector.multi_reduction <add>, %90, %cst_29 [0] : vector<16x128xf32> to vector<128xf32>
    %92 = vector.shape_cast %91 : vector<128xf32> to vector<1x128xf32>
    %93 = vector.extract_strided_slice %2 {offsets = [4, 0], sizes = [1, 128], strides = [1, 1]} : vector<8x128xf32> to vector<1x128xf32>
    %94 = arith.mulf %93, %49 : vector<1x128xf32>
    %95 = arith.addf %92, %94 : vector<1x128xf32>
    %96 = arith.negf %26 : vector<1x128xf32>
    %97 = math.exp %96 : vector<1x128xf32>
    %cst_30 = arith.constant 1.000000e+00 : f32
    %98 = vector.broadcast %cst_30 : f32 to vector<1x128xf32>
    %99 = arith.addf %98, %97 : vector<1x128xf32>
    %100 = arith.divf %98, %99 : vector<1x128xf32>
    %101 = arith.mulf %26, %100 : vector<1x128xf32>
    %102 = arith.mulf %95, %101 : vector<1x128xf32>
    %c0_31 = arith.constant 0 : index
    %c0_32 = arith.constant 0 : index
    %103 = vector.load %arg6[%c0_31, %c0_32] : memref<128x64xf32, #tpu.memory_space<vmem>>, vector<128x64xf32>
    %cst_33 = arith.constant dense<0.000000e+00> : vector<1x64xf32>
    %104 = tpu.matmul %102, %103, %cst_33 {dimension_numbers = #tpu.dot_dimension_numbers<[1], [0], [0], [1], [0, 0, 1, 1], [], []>} : vector<1x128xf32>, vector<128x64xf32>, vector<1x64xf32> -> vector<1x64xf32>
    %105 = tpu.concatenate %104, %5 in 1 : vector<1x64xf32>, vector<1x64xf32> -> vector<1x128xf32>
    %c0_34 = arith.constant 0 : index
    %c0_35 = arith.constant 0 : index
    %106 = vector.load %arg8[%c0_34, %c0_35] : memref<1x128xf32, #tpu.memory_space<vmem>>, vector<1x128xf32>
    tpu.vector_store %arg8[%c0_34, %c0_35], %105 {strides = array<i32>} : memref<1x128xf32, #tpu.memory_space<vmem>>, vector<1x128xf32>,
    return
  }
}

</mosaic_0001>

<bundles_post_ra>
// kernel: squeeze.3
= control target key start
LH: loop header
LB: loop body
LE: loop exit
PB: predicated region body
PF: predicated region fallthrough
CT: control target
= control target key end

     0   :  { %s85_s0 = inlined_call_operand.vmem [shape: f32[64], index: 0, kind: input, shape index: {}]   ;;  %s86_s1 = inlined_call_operand.hbm [shape: f32[2,32], index: 1, kind: output, shape index: {}]  }
   0x1   :  { %v5_v0 = vld [vmem:[%s85_s0] sm:$0x1] }
   0x2   :  { %2 = vsyncpa [#allocation1], 0  ;;  %6 = vst [vmem:[#allocation3] sm:$0x1] %v5_v0  ;;  %vm8_vm0 = vcmask 261120   ;;  %s58_s0 = smov 96  }
   0x3   :  { %s59_s8 = smov [#allocation0]  }
   0x4   :  { %s26_s9 = sshll.u32 %s59_s8, 4  ;;  %s27_s9 = int_to_ptr.vmem [resolvable:$true] %s26_s9 }
   0x5   :  { %s34_s10 = scalar_lea.vmem %s27_s9, 32  ;;  %p39_p1 = scmp.lt.s32.totalorder %s27_s9, %s27_s9 }
   0x6   :  { %p35_p0 = scmp.ne.s32.totalorder %s27_s9, %s34_s10  ;;  %p40_p2 = scmp.lt.s32.totalorder %s34_s10, %s34_s10 }
   0x8   :  { %p41_p3 = por %p40_p2, %p39_p1 }
   0x9   :  { %v10_v1 = vld [vmem:[#allocation3] sm:$0x1]  }
   0xa   :  { %v7_v2 = vld [vmem:[#allocation3] sm:$0x1]   ;;  %11 = vrot.lane.b32.xlu0 %v10_v1, %s58_s0  ;;  %p42_p4 = pnand %p41_p3, %p35_p0 }
   0xb   :  { %9 = vst.msk [vmem:[#allocation2] sm:$0x1] %vm8_vm0, %v7_v2  }
  0x7c   :  { %v12_v3 = vpop.permute.xlu0 %11  }
  0x7d   :  { %15 = vst.msk [vmem:[#allocation2 + $0x1] sm:$0x1] %vm8_vm0, %v12_v3  }
  0x84   :  { %v19_v4 = vld [vmem:[#allocation2] sm:$0x3] }
  0x85   :  { %21 = vst [vmem:[#allocation0] sm:$0x3] %v19_v4 }
  0x86   :  { %45 = shalt.err (!%p42_p4)
}
  0x87   :  { %s46_s13 = scalar_lea.hbm %s86_s1, 32 }
  0x88   :  { %p47_p5 = scmp.ne.s32.totalorder %s86_s1, %s46_s13  ;;  %p50_p6 = scmp.lt.u32.totalorder %s46_s13, %s86_s1 }
  0x8a   :  { %p52_p7 = pnand %p50_p6, %p47_p5 }
  0x8c   :  { %55 = shalt.err (!%p52_p7)
}
  0x8d   :  { %29 = dma.vmem_to_hbm [thread:$0]  %s27_s9, 32, %s86_s1, [#allocation1]  }
  0x8e   :  { %56 = dma.done.wait [#allocation1], 32  }
  0x8f   :  { %57 = vsyncadd [#allocation1], 4294967264 }
  0x90   :  { %31 = vsyncpa [#allocation1], 1 }

// kernel: rlblock_step.1
= control target key start
LH: loop header
LB: loop body
LE: loop exit
PB: predicated region body
PF: predicated region fallthrough
CT: control target
= control target key end

     0   :  { %v49_v0 = vlaneseq  ;;  %v2177_v1 = vmov 0.0|0.0   ;;  %vm2178_vm0 = vmmov 0   ;;  %v2179_v5 = vmov 0.0   ;;  %s2182_s28 = smov 64   ;;  %s2700_s7 = inlined_call_operand.vmem [shape: f32[104,128], index: 7, kind: input, shape index: {}]   ;;  %s2701_s0 = inlined_call_operand.vmem [shape: f32[1,64], index: 0, kind: input, shape index: {}]   ;;  %s2702_s1 = inlined_call_operand.vmem [shape: f32[1,64], index: 1, kind: input, shape index: {}]   ;;  %s2703_s4 = inlined_call_operand.vmem [shape: f32[64,256], index: 4, kind: input, shape index: {}]   ;;  %s2704_s2 = inlined_call_operand.vmem [shape: f32[4,128], index: 2, kind: input, shape index: {}, may-alias: {2,9}]   ;;  %s2705_s9 = inlined_call_operand.vmem [shape: f32[4,128], index: 9, kind: output, shape index: {1}, may-alias: {2,9}]   ;;  %s2706_s5 = inlined_call_operand.vmem [shape: f32[128,192], index: 5, kind: input, shape index: {}]   ;;  %s2707_s6 = inlined_call_operand.vmem [shape: f32[128,64], index: 6, kind: input, shape index: {}]   ;;  %s2708_s3 = inlined_call_operand.vmem [shape: f32[16,128], index: 3, kind: input, shape index: {}, may-alias: {3,10}]   ;;  %s2709_s10 = inlined_call_operand.vmem [shape: f32[16,128], index: 10, kind: output, shape index: {2}, may-alias: {3,10}]   ;;  %s2710_s8 = inlined_call_operand.vmem [shape: f32[1,128], index: 8, kind: output, shape index: {0}]  }
   0x1   :  { %1979 = vmatprep.subr.bf16.mxu0 %v2177_v1  ;;  %v39_v2 = vld [vmem:[%s2700_s7 + $0x28] sm:$0xff]  ;;  %v40_v3 = vld [vmem:[%s2700_s7 + $0x30] sm:$0xff]  ;;  %v41_v4 = vld [vmem:[%s2700_s7 + $0x38] sm:$0xff]  ;;  %1798 = vmatprep.mubr.msk.f32.mxu0 %vm2178_vm0, %v2179_v5  ;;  %vm54_vm1 = vcmask 1040384   ;;  %vm56_vm2 = vcmask 523264   ;;  %vm938_vm3 = vcmask 1041408  }
   0x2   :  { %v61_v6 = vand.u32 4294901760, %v39_v2  ;;  %v64_v7 = vand.u32 4294901760, %v40_v3  ;;  %v42_v8 = vld [vmem:[%s2700_s7 + $0x40] sm:$0xff]  ;;  %v67_v9 = vand.u32 4294901760, %v41_v4  ;;  %858 = vmatprep.mubr.f32.mxu1 %v2179_v5  ;;  %v43_v11 = vld [vmem:[%s2700_s7 + $0x48] sm:$0xff]  ;;  %v44_v12 = vld [vmem:[%s2700_s7 + $0x50] sm:$0xff] }
   0x3   :  { %v70_v10 = vand.u32 4294901760, %v42_v8  ;;  %v2260_v13 = vshrl.u32 %v49_v0, 7  ;;  %v36_v15 = vld [vmem:[%s2701_s0] sm:$0x1]  ;;  %v73_v20 = vand.u32 4294901760, %v43_v11  ;;  %v76_v21 = vand.u32 4294901760, %v44_v12 }
   0x4   :  { %v2262_v14 = vpack.c.bf16 %v64_v7, %v61_v6  ;;  %v37_v16 = vld [vmem:[%s2702_s1] sm:$0x1]  ;;  %v2270_v17 = vsub.f32 %v39_v2, %v61_v6  ;;  %v2272_v18 = vsub.f32 %v40_v3, %v64_v7  ;;  %v45_v23 = vld [vmem:[%s2700_s7 + $0x58] sm:$0xff]  ;;  %v2289_v26 = vsub.f32 %v41_v4, %v67_v9 }
   0x5   :  { %v2275_v19 = vpack.c.bf16 %v70_v10, %v67_v9  ;;  %v2277_v22 = vadd.f32 %v37_v16, %v36_v15  ;;  %v46_v24 = vld [vmem:[%s2700_s7 + $0x60] sm:$0xff]  ;;  %v2287_v25 = vsub.s32 0, %v2260_v13  ;;  %v2293_v28 = vsub.f32 %v42_v8, %v70_v10 }
   0x6   :  { %1981 = vmatpush3.bf16.msra.mxu0 %v2262_v14  ;;  %v146_v29 = vand.u32 4294901760, %v2270_v17  ;;  %v153_v30 = vand.u32 4294901760, %v2272_v18  ;;  %v2298_v31 = vpack.c.bf16 %v76_v21, %v73_v20  ;;  %v79_v32 = vand.u32 4294901760, %v45_v23 }
   0x7   :  { %1982 = vmatprep.subr.bf16.mxu0 %v2177_v1  ;;  %v47_v27 = vmul.f32 %v2277_v22, %v2277_v22  ;;  %v82_v33 = vand.u32 4294901760, %v46_v24  ;;  %v2302_v35 = vsub.f32 %v43_v11, %v73_v20  ;;  %v2304_v36 = vsub.f32 %v44_v12, %v76_v21 }
   0x8   :  { %v160_v38 = vand.u32 4294901760, %v2289_v26  ;;  %v147_v40 = vsub.f32 %v2270_v17, %v146_v29  ;;  %v154_v41 = vsub.f32 %v2272_v18, %v153_v30  ;;  %v167_v42 = vand.u32 4294901760, %v2293_v28 }
   0x9   :  { %v52_v34 = vrot.slane %v47_v27, %v2287_v25  ;;  %v2318_v43 = vpack.c.bf16 %v82_v33, %v79_v32  ;;  %v2323_v45 = vsub.f32 %v45_v23, %v79_v32  ;;  %v2325_v46 = vsub.f32 %v46_v24, %v82_v33  ;;  %v642_v24 = vld [vmem:[%s2703_s4] sm:$0xff]  ;;  %v648_v32 = vld [vmem:[%s2703_s4 + $0x30] sm:$0xff] }
   0xa   :  { %1984 = vmatpush3.bf16.msra.mxu0 %v2275_v19  ;;  %v161_v48 = vsub.f32 %v2289_v26, %v160_v38  ;;  %v174_v49 = vand.u32 4294901760, %v2302_v35  ;;  %v148_v50 = vand.u32 4294901760, %v147_v40  ;;  %v155_v51 = vand.u32 4294901760, %v154_v41  ;;  %v655_v40 = vld [vmem:[%s2703_s4 + $0x68] sm:$0xff]  ;;  %v657_v41 = vld [vmem:[%s2703_s4 + $0x78] sm:$0xff] }
   0xb   :  { %1985 = vmatprep.subr.bf16.mxu0 %v2177_v1  ;;  %v55_v37 = vsel %vm54_vm1, %v2277_v22, %v52_v34  ;;  %v168_v52 = vsub.f32 %v2293_v28, %v167_v42  ;;  %v181_v53 = vand.u32 4294901760, %v2304_v36  ;;  %v188_v58 = vand.u32 4294901760, %v2323_v45  ;;  %v651_v34 = vld [vmem:[%s2703_s4 + $0x48] sm:$0xff] }
   0xc   :  { %v58_v39 = vsel %vm56_vm2, %v55_v37, 0  ;;  %v162_v56 = vand.u32 4294901760, %v161_v48  ;;  %v175_v57 = vsub.f32 %v2302_v35, %v174_v49  ;;  %v1992_v59 = vpack.c.bf16 %v155_v51, %v148_v50  ;;  %v650_v37 = vld [vmem:[%s2703_s4 + $0x40] sm:$0xff] }
   0xd   :  { %v2320_v44 = vand.u32 4294901760, %v58_v39  ;;  %v169_v60 = vand.u32 4294901760, %v168_v52  ;;  %v182_v61 = vsub.f32 %v2304_v36, %v181_v53  ;;  %v195_v62 = vand.u32 4294901760, %v2325_v46 }
   0xe   :  { %1987 = vmatpush3.bf16.msra.mxu0 %v2298_v31  ;;  %v189_v0 = vsub.f32 %v2323_v45, %v188_v58  ;;  %v176_v3 = vand.u32 4294901760, %v175_v57  ;;  %v2004_v11 = vpack.c.bf16 %v2272_v18, %v2270_v17  ;;  %v2007_v12 = vpack.c.bf16 %v2293_v28, %v2289_v26  ;;  %v644_v26 = vld [vmem:[%s2703_s4 + $0x10] sm:$0xff]  ;;  %v647_v28 = vld [vmem:[%s2703_s4 + $0x28] sm:$0xff] }
   0xf   :  { %1988 = vmatprep.subr.bf16.mxu0 %v2177_v1  ;;  %v2328_v47 = vsub.f32 %v58_v39, %v2320_v44  ;;  %v1995_v2 = vpack.c.bf16 %v169_v60, %v162_v56  ;;  %v183_v4 = vand.u32 4294901760, %v182_v61  ;;  %v196_v6 = vsub.f32 %v2325_v46, %v195_v62  ;;  %v2474_v56 = vld [vmem:[%s2700_s7 + $0x18] sm:$0xff] }
  0x10   :  { %v190_v8 = vand.u32 4294901760, %v189_v0  ;;  %v2010_v15 = vpack.c.bf16 %v2304_v36, %v2302_v35  ;;  %v2013_v16 = vpack.c.bf16 %v2325_v46, %v2323_v45  ;;  %v2028_v20 = vpack.c.bf16 %v153_v30, %v146_v29  ;;  %v649_v29 = vld [vmem:[%s2703_s4 + $0x38] sm:$0xff]  ;;  %v2465_v46 = vld [vmem:[%s2704_s2] sm:$0xf] }
  0x11   :  { %v135_v54 = vand.u32 4294901760, %v2328_v47  ;;  %v1998_v7 = vpack.c.bf16 %v183_v4, %v176_v3  ;;  %v197_v9 = vand.u32 4294901760, %v196_v6  ;;  %v2031_v21 = vpack.c.bf16 %v167_v42, %v160_v38  ;;  %v653_v35 = vld [vmem:[%s2703_s4 + $0x58] sm:$0xff]  ;;  %v652_v38 = vld [vmem:[%s2703_s4 + $0x50] sm:$0xff]  ;;  %760 = vst [vmem:[%s2705_s9 - $0x1] sm:$0xe] %v2465_v46 }
  0x12   :  { %1990 = vmatpush3.bf16.msra.mxu0 %v2318_v43  ;;  %v2034_v17 = vpack.c.bf16 %v181_v53, %v174_v49  ;;  %v2037_v18 = vpack.c.bf16 %v195_v62, %v188_v58  ;;  %v2053_v27 = vpack.c.bf16 %v644_v26, %v642_v24  ;;  %v2055_v30 = vpack.c.bf16 %v649_v29, %v647_v28  ;;  %v772_v24 = vld [vmem:[%s2706_s5 + $0x50] sm:$0xff]  ;;  %v777_v28 = vld [vmem:[%s2706_s5 + $0x78] sm:$0xff] }
  0x13   :  { %1991 = vmatprep.subr.bf16.mxu0 %v2177_v1  ;;  %v136_v55 = vsub.f32 %v2328_v47, %v135_v54  ;;  %v2001_v10 = vpack.c.bf16 %v197_v9, %v190_v8  ;;  %v2059_v36 = vpack.c.bf16 %v653_v35, %v651_v34  ;;  %v2061_v39 = vpack.c.bf16 %v652_v38, %v650_v37  ;;  %v762_v9 = vld [vmem:[%s2706_s5] sm:$0xff]  ;;  %v781_v34 = vld [vmem:[%s2706_s5 + $0x98] sm:$0xff]  ;;  %v780_v37 = vld [vmem:[%s2706_s5 + $0x90] sm:$0xff] }
  0x14   :  { %v2063_v42 = vpack.c.bf16 %v657_v41, %v655_v40  ;;  %v2180_v53 = vmov 1966171168   ;;  %v785_v40 = vld [vmem:[%s2706_s5 + $0xb8] sm:$0xff]  ;;  %vm925_vm4 = vcmask 15360  }
  0x15   :  { %v137_v63 = vand.u32 4294901760, %v136_v55 }
  0x17   :  { %1799 = vmatmul.mubr.f32.vlgmr.msra.gmra.mrb[0].mxu0 %v137_v63 }
  0x18   :  { %1993 = vmatpush3.bf16.msra.mxu0 %v1992_v59  ;;  %1817 = vmatprep.mubr.msk.f32.mxu0 %vm2178_vm0, %v2179_v5 }
  0x19   :  { %1994 = vmatprep.subr.bf16.mxu0 %v2177_v1 }
  0x1c   :  { %1996 = vmatpush3.bf16.msra.mxu0 %v1995_v2 }
  0x1d   :  { %1997 = vmatprep.subr.bf16.mxu0 %v2177_v1 }
  0x20   :  { %1999 = vmatpush3.bf16.msra.mxu0 %v1998_v7  ;;  %v765_v7 = vld [vmem:[%s2706_s5 + $0x18] sm:$0xff] }
  0x21   :  { %2000 = vmatprep.subr.bf16.mxu0 %v2177_v1 }
  0x24   :  { %2002 = vmatpush3.bf16.msra.mxu0 %v2001_v10  ;;  %v764_v10 = vld [vmem:[%s2706_s5 + $0x10] sm:$0xff] }
  0x25   :  { %2003 = vmatprep.subr.bf16.mxu0 %v2177_v1 }
  0x27   :  { %1818 = vmatmul.mubr.f32.vlgmr.msra.gmra.mrb[0].mxu0 %v2320_v44 }
  0x28   :  { %2005 = vmatpush3.bf16.msra.mxu0 %v2004_v11  ;;  %1836 = vmatprep.mubr.msk.f32.mxu0 %vm2178_vm0, %v2179_v5  ;;  %v2069_v11 = vpack.c.bf16 %v764_v10, %v762_v9 }
  0x29   :  { %2006 = vmatprep.subr.bf16.mxu0 %v2177_v1 }
  0x2c   :  { %2008 = vmatpush3.bf16.msra.mxu0 %v2007_v12  ;;  %v767_v12 = vld [vmem:[%s2706_s5 + $0x28] sm:$0xff] }
  0x2d   :  { %2009 = vmatprep.subr.bf16.mxu0 %v2177_v1 }
  0x30   :  { %2011 = vmatpush3.bf16.msra.mxu0 %v2010_v15  ;;  %v769_v15 = vld [vmem:[%s2706_s5 + $0x38] sm:$0xff] }
  0x31   :  { %2012 = vmatprep.subr.bf16.mxu0 %v2177_v1 }
  0x34   :  { %2014 = vmatpush3.bf16.msra.mxu0 %v2013_v16  ;;  %v2071_v16 = vpack.c.bf16 %v769_v15, %v767_v12 }
  0x35   :  { %2015 = vmatprep.subr.bf16.mxu0 %v2177_v1 }
  0x37   :  { %1837 = vmatmul.mubr.f32.vlgmr.msra.gmra.mrb[0].mxu0 %v2328_v47 }
  0x38   :  { %2017 = vmatpush3.bf16.msra.mxu0 %v2262_v14  ;;  %1855 = vmatprep.mubr.msk.f32.mxu0 %vm2178_vm0, %v2179_v5 }
  0x39   :  { %2018 = vmatprep.subr.bf16.mxu0 %v2177_v1 }
  0x3c   :  { %2020 = vmatpush3.bf16.msra.mxu0 %v2275_v19 }
  0x3d   :  { %2021 = vmatprep.subr.bf16.mxu0 %v2177_v1 }
  0x40   :  { %2023 = vmatpush3.bf16.msra.mxu0 %v2298_v31 }
  0x41   :  { %2024 = vmatprep.subr.bf16.mxu0 %v2177_v1 }
  0x44   :  { %2026 = vmatpush3.bf16.msra.mxu0 %v2318_v43 }
  0x45   :  { %2027 = vmatprep.subr.bf16.mxu0 %v2177_v1 }
  0x47   :  { %1856 = vmatmul.mubr.f32.vlgmr.msra.gmra.mrb[0].mxu0 %v135_v54  ;;  %v607_v54 = vunpack.c.l.s4 %v2180_v53  ;;  %v793_v53 = vld [vmem:[%s2706_s5 + $0xf8] sm:$0xff] }
  0x48   :  { %2029 = vmatpush3.bf16.msra.mxu0 %v2028_v20  ;;  %1874 = vmatprep.mubr.msk.f32.mxu0 %vm2178_vm0, %v2179_v5  ;;  %v766_v20 = vld [vmem:[%s2706_s5 + $0x20] sm:$0xff] }
  0x49   :  { %2030 = vmatprep.subr.bf16.mxu0 %v2177_v1  ;;  %v608_v55 = vunpack.c.0.s8 %v607_v54  ;;  %v790_v54 = vld [vmem:[%s2706_s5 + $0xe0] sm:$0xff] }
  0x4b   :  { %v611_v57 = vsub.s32 %v608_v55, %v2260_v13  ;;  %v763_v13 = vld [vmem:[%s2706_s5 + $0x8] sm:$0xff] }
  0x4c   :  { %2032 = vmatpush3.bf16.msra.mxu0 %v2031_v21  ;;  %v2067_v8 = vpack.c.bf16 %v765_v7, %v763_v13  ;;  %v768_v21 = vld [vmem:[%s2706_s5 + $0x30] sm:$0xff] }
  0x4d   :  { %2033 = vmatprep.subr.bf16.mxu0 %v2177_v1  ;;  %v631_v58 = vrot.slane %v2474_v56, %v611_v57 }
  0x4e   :  { %2068 = vmatprep.subr.bf16.mxu1 %v2067_v8 }
  0x4f   :  { %v632_v62 = vcombine.high %v631_v58, %v631_v58  ;;  %2070 = vmatpush1.bf16.msra.mxu1 %v2069_v11 }
  0x50   :  { %2035 = vmatpush3.bf16.msra.mxu0 %v2034_v17  ;;  %v2073_v17 = vpack.c.bf16 %v768_v21, %v766_v20  ;;  %2072 = vmatprep.subr.bf16.mxu1 %v2071_v16 }
  0x51   :  { %2036 = vmatprep.subr.bf16.mxu0 %v2177_v1  ;;  %v639_v3 = vrot.slane %v632_v62, %v611_v57 }
  0x53   :  { %2074 = vmatpush1.bf16.msra.mxu1 %v2073_v17 }
  0x54   :  { %2038 = vmatpush3.bf16.msra.mxu0 %v2037_v18  ;;  %v771_v18 = vld [vmem:[%s2706_s5 + $0x48] sm:$0xff] }
  0x55   :  { %2039 = vmatprep.subr.bf16.mxu0 %v2177_v1 }
  0x57   :  { %1875 = vmatmul.mubr.f32.vlgmr.msra.gmra.mrb[0].mxu0 %v2320_v44 }
  0x58   :  { %2041 = vmatpush3.bf16.msra.mxu0 %v2262_v14  ;;  %1893 = vmatprep.mubr.msk.f32.mxu0 %vm2178_vm0, %v2179_v5  ;;  %v643_v14 = vld [vmem:[%s2703_s4 + $0x8] sm:$0xff] }
  0x59   :  { %2042 = vmatprep.subr.bf16.mxu0 %v2177_v1 }
  0x5c   :  { %2044 = vmatpush3.bf16.msra.mxu0 %v2275_v19  ;;  %v645_v19 = vld [vmem:[%s2703_s4 + $0x18] sm:$0xff] }
  0x5d   :  { %2045 = vmatprep.subr.bf16.mxu0 %v2177_v1  ;;  %v2051_v23 = vpack.c.bf16 %v645_v19, %v643_v14  ;;  %v773_v14 = vld [vmem:[%s2706_s5 + $0x58] sm:$0xff] }
  0x5e   :  { %v2075_v19 = vpack.c.bf16 %v773_v14, %v771_v18 }
  0x60   :  { %2047 = vmatpush3.bf16.msra.mxu0 %v2298_v31  ;;  %v646_v31 = vld [vmem:[%s2703_s4 + $0x20] sm:$0xff]  ;;  %2076 = vmatprep.subr.bf16.mxu1 %v2075_v19 }
  0x61   :  { %2048 = vmatprep.subr.bf16.mxu0 %v2177_v1  ;;  %v2057_v33 = vpack.c.bf16 %v648_v32, %v646_v31  ;;  %v776_v31 = vld [vmem:[%s2706_s5 + $0x70] sm:$0xff]  ;;  %v892_v19 = vld [vmem:[%s2700_s7 + $0x20] sm:$0x3] }
  0x64   :  { %2050 = vmatpush3.bf16.msra.mxu0 %v2318_v43  ;;  %v654_v43 = vld [vmem:[%s2703_s4 + $0x60] sm:$0xff] }
  0x65   :  { %2052 = vmatprep.subr.bf16.mxu0 %v2051_v23  ;;  %v770_v23 = vld [vmem:[%s2706_s5 + $0x40] sm:$0xff] }
  0x66   :  { %v2077_v26 = vpack.c.bf16 %v772_v24, %v770_v23  ;;  %v940_v23 = vsel %vm938_vm3, %v892_v19, 0  ;;  %v1582_v19 = vld [vmem:[%s2707_s6 + $0x78] sm:$0xff] }
  0x67   :  { %1894 = vmatmul.mubr.f32.vlgmr.msra.gmra.mrb[0].mxu0 %v2320_v44  ;;  %v656_v44 = vld [vmem:[%s2703_s4 + $0x70] sm:$0xff]  ;;  %v2596_v24 = vand.u32 4294901760, %v940_v23 }
  0x68   :  { %725 = vmatprep.mubr.f32.mxu0 %v2179_v5  ;;  %2054 = vmatpush1.bf16.msra.mxu0 %v2053_v27  ;;  %v2065_v45 = vpack.c.bf16 %v656_v44, %v654_v43  ;;  %v775_v27 = vld [vmem:[%s2706_s5 + $0x68] sm:$0xff]  ;;  %v784_v43 = vld [vmem:[%s2706_s5 + $0xb0] sm:$0xff] }
  0x69   :  { %2056 = vmatprep.subr.bf16.mxu0 %v2055_v30  ;;  %2078 = vmatpush1.bf16.msra.mxu1 %v2077_v26  ;;  %v2079_v29 = vpack.c.bf16 %v777_v28, %v775_v27  ;;  %v774_v30 = vld [vmem:[%s2706_s5 + $0x60] sm:$0xff]  ;;  %v1050_v26 = vsub.f32 %v940_v23, %v2596_v24 }
  0x6a   :  { %v2081_v32 = vpack.c.bf16 %v776_v31, %v774_v30 }
  0x6b   :  { %2080 = vmatprep.subr.bf16.mxu1 %v2079_v29  ;;  %v1051_v27 = vand.u32 4294901760, %v1050_v26 }
  0x6c   :  { %2058 = vmatpush1.bf16.msra.mxu0 %v2057_v33  ;;  %v779_v33 = vld [vmem:[%s2706_s5 + $0x88] sm:$0xff] }
  0x6d   :  { %2060 = vmatprep.subr.bf16.mxu0 %v2059_v36  ;;  %2082 = vmatpush1.bf16.msra.mxu1 %v2081_v32  ;;  %v2083_v35 = vpack.c.bf16 %v781_v34, %v779_v33  ;;  %v778_v36 = vld [vmem:[%s2706_s5 + $0x80] sm:$0xff]  ;;  %v1052_v28 = vsub.f32 %v1050_v26, %v1051_v27 }
  0x6e   :  { %v2085_v38 = vpack.c.bf16 %v780_v37, %v778_v36 }
  0x6f   :  { %2084 = vmatprep.subr.bf16.mxu1 %v2083_v35  ;;  %v1053_v29 = vand.u32 4294901760, %v1052_v28 }
  0x70   :  { %2062 = vmatpush1.bf16.msra.mxu0 %v2061_v39  ;;  %v783_v39 = vld [vmem:[%s2706_s5 + $0xa8] sm:$0xff] }
  0x71   :  { %2064 = vmatprep.subr.bf16.mxu0 %v2063_v42  ;;  %2086 = vmatpush1.bf16.msra.mxu1 %v2085_v38  ;;  %v2087_v41 = vpack.c.bf16 %v785_v40, %v783_v39  ;;  %v782_v42 = vld [vmem:[%s2706_s5 + $0xa0] sm:$0xff] }
  0x72   :  { %v2089_v44 = vpack.c.bf16 %v784_v43, %v782_v42 }
  0x73   :  { %2088 = vmatprep.subr.bf16.mxu1 %v2087_v41 }
  0x74   :  { %2066 = vmatpush1.bf16.msra.mxu0 %v2065_v45  ;;  %v787_v45 = vld [vmem:[%s2706_s5 + $0xc8] sm:$0xff] }
  0x75   :  { %2090 = vmatpush1.bf16.msra.mxu1 %v2089_v44 }
 0x13a   :  { %v593_v47 = vpop.f32.mrb[0].mxu0 }
 0x13b   :  { %v597_v48 = vmul.f32 %v593_v47, %v593_v47  ;;  %v1895_v49 = vpop.f32.mrb[1].mxu0  ;;  %v602_v63 = vsub.f32 %v2277_v22, %v593_v47 }
 0x13c   :  { %v786_v49 = vld [vmem:[%s2706_s5 + $0xc0] sm:$0xff] }
 0x13d   :  { %v599_v50 = vrot.slane %v597_v48, 7 }
 0x13f   :  { %v601_v51 = vsub.f32 %v593_v47, %v599_v50  ;;  %v789_v47 = vld [vmem:[%s2706_s5 + $0xd8] sm:$0xff]  ;;  %v788_v50 = vld [vmem:[%s2706_s5 + $0xd0] sm:$0xff] }
 0x140   :  { %v2091_v48 = vpack.c.bf16 %v789_v47, %v787_v45 }
 0x141   :  { %v603_v52 = vadd.f32 1e-05, %v601_v51  ;;  %v2093_v51 = vpack.c.bf16 %v788_v50, %v786_v49 }
 0x142   :  { %2092 = vmatprep.subr.bf16.mxu1 %v2091_v48 }
 0x143   :  { %2159 = vrsqrt.f32 %v603_v52  ;;  %v791_v52 = vld [vmem:[%s2706_s5 + $0xe8] sm:$0xff]  ;;  %2094 = vmatpush1.bf16.msra.mxu1 %v2093_v51 }
 0x144   :  { %v2095_v55 = vpack.c.bf16 %v793_v53, %v791_v52 }
 0x146   :  { %2096 = vmatprep.subr.bf16.mxu1 %v2095_v55 }
 0x14d   :  { %v2160_v59 = vpop.eup %2159 }
 0x14e   :  { %v612_v60 = vrot.slane %v2160_v59, %v611_v57  ;;  %v732_v59 = vld [vmem:[%s2700_s7 + $0x10] sm:$0xf] }
 0x150   :  { %v613_v61 = vcombine.high %v612_v60, %v612_v60  ;;  %v740_v60 = vrot.slane %v732_v59, 7 }
 0x152   :  { %v620_v0 = vrot.slane %v613_v61, %v611_v57  ;;  %v792_v57 = vld [vmem:[%s2706_s5 + $0xf0] sm:$0xff]  ;;  %v734_v61 = vrot.slane %v732_v59, 3  ;;  %v742_v62 = vmul.f32 %v740_v60, %v2465_v46  ;;  %s2181_s5 = smov 96   ;;  %v1567_v60 = vld [vmem:[%s2707_s6] sm:$0xff] }
 0x153   :  { %v2097_v58 = vpack.c.bf16 %v792_v57, %v790_v54 }
 0x154   :  { %v622_v2 = vmul.f32 %v620_v0, %v602_v63  ;;  %v737_v63 = vrot.slane %v2474_v56, 2  ;;  %v747_v13 = vrot.slane %v742_v62, 2  ;;  %v750_v8 = vrot.slane %v742_v62, 3 }
 0x155   :  { %2098 = vmatpush1.bf16.msra.mxu1 %v2097_v58 }
 0x156   :  { %v623_v4 = vmul.f32 %v622_v2, %v2474_v56  ;;  %1896 = vmatprep.subr.mxu1 %v2596_v24 }
 0x158   :  { %v641_v6 = vadd.f32 %v639_v3, %v623_v4  ;;  %v744_v3 = vrot.slane %v742_v62, 1 }
 0x15a   :  { %1678 = vmatmul.mubr.msk.f32.vlgmr.msra.gmra.mrb[2].mxu0 %vm56_vm2, %v641_v6 }
 0x22d   :  { %v727_v0 = vpop.f32.mrb[2].mxu0 }
 0x22e   :  { %v736_v2 = vmul.f32 %v734_v61, %v727_v0  ;;  %761 = vst [vmem:[%s2705_s9 + $0x3] sm:$0x1] %v727_v0  ;;  %v2585_v4 = vpop.f32.mrb[3].mxu0  ;;  %v1568_v61 = vld [vmem:[%s2707_s6 + $0x8] sm:$0xff]  ;;  %v1570_v0 = vld [vmem:[%s2707_s6 + $0x18] sm:$0xff] }
 0x22f   :  { %v2100_v62 = vpack.c.bf16 %v1568_v61, %v1567_v60 }
 0x230   :  { %v739_v6 = vadd.f32 %v737_v63, %v736_v2  ;;  %v1569_v63 = vld [vmem:[%s2707_s6 + $0x10] sm:$0xff] }
 0x231   :  { %v2103_v2 = vpack.c.bf16 %v1570_v0, %v1569_v63 }
 0x232   :  { %v746_v7 = vadd.f32 %v744_v3, %v739_v6  ;;  %v1571_v3 = vld [vmem:[%s2707_s6 + $0x20] sm:$0xff] }
 0x234   :  { %v749_v9 = vadd.f32 %v747_v13, %v746_v7  ;;  %v1573_v13 = vld [vmem:[%s2707_s6 + $0x30] sm:$0xff]  ;;  %v1574_v7 = vld [vmem:[%s2707_s6 + $0x38] sm:$0xff] }
 0x236   :  { %v752_v10 = vadd.f32 %v750_v8, %v749_v9  ;;  %v2109_v8 = vpack.c.bf16 %v1574_v7, %v1573_v13  ;;  %v1575_v9 = vld [vmem:[%s2707_s6 + $0x40] sm:$0xff] }
 0x238   :  { %v1679_v11 = vmul.f32 -1.442695, %v752_v10 }
 0x23a   :  { %2161 = vpow2.f32 %v1679_v11 }
 0x244   :  { %v2162_v46 = vpop.eup %2161 }
 0x245   :  { %v756_v12 = vadd.f32 1.0, %v2162_v46  ;;  %v1577_v46 = vld [vmem:[%s2707_s6 + $0x50] sm:$0xff] }
 0x247   :  { %2163 = vrcp.f32 %v756_v12  ;;  %v1578_v12 = vld [vmem:[%s2707_s6 + $0x58] sm:$0xff] }
 0x251   :  { %v2164_v15 = vpop.eup %2163 }
 0x252   :  { %v2587_v16 = vmul.f32 %v2164_v15, %v752_v10  ;;  %v1576_v10 = vld [vmem:[%s2707_s6 + $0x48] sm:$0xff]  ;;  %v2115_v15 = vpack.c.bf16 %v1578_v12, %v1577_v46 }
 0x253   :  { %v2112_v11 = vpack.c.bf16 %v1576_v10, %v1575_v9 }
 0x254   :  { %859 = vmatmul.mubr.f32.vlgmr.msra.gmra.mrb[0].mxu1 %v2587_v16 }
 0x255   :  { %1897 = vmatpush3.msra.mxu1 %v2596_v24 }
 0x256   :  { %1904 = vmatprep.subr.mxu1 %v1053_v29 }
 0x327   :  { %v2590_v20 = vpop.f32.mrb[0].mxu1 }
 0x328   :  { %v862_v21 = vpop.f32.mrb[1].mxu1 }
 0x329   :  { %v887_v17 = vrot.slane %v862_v21, 7 }
 0x32b   :  { %888 = vrot.lane.b32.xlu0 %v887_v17, %s2181_s5  ;;  %v1580_v17 = vld [vmem:[%s2707_s6 + $0x68] sm:$0xff] }
 0x39d   :  { %v889_v18 = vpop.permute.xlu0 %888 }
 0x39e   :  { %v891_v14 = vsel %vm54_vm1, %v862_v21, %v889_v18  ;;  %v1579_v21 = vld [vmem:[%s2707_s6 + $0x60] sm:$0xff] }
 0x39f   :  { %893 = vxpose.xlu0.b32.start.end [1/1] (short) (narrow) %v891_v14, 32  ;;  %v2118_v18 = vpack.c.bf16 %v1580_v17, %v1579_v21  ;;  %v1581_v14 = vld [vmem:[%s2707_s6 + $0x70] sm:$0xff] }
 0x3a0   :  { %v2121_v23 = vpack.c.bf16 %v1582_v19, %v1581_v14 }
 0x41f   :  { %v909_v30 = vpop.trf.xlu0 }
 0x420   :  { %v927_v31 = vsel %vm925_vm4, %v909_v30, 0 }
 0x421   :  { %v1008_v32 = vand.u32 4294901760, %v927_v31 }
 0x423   :  { %v1009_v33 = vsub.f32 %v927_v31, %v1008_v32  ;;  %v910_v34 = vpop.trf.xlu0 }
 0x424   :  { %v930_v35 = vsel %vm925_vm4, %v910_v34, 0 }
 0x425   :  { %v1010_v36 = vand.u32 4294901760, %v1009_v33  ;;  %v1018_v37 = vand.u32 4294901760, %v930_v35 }
 0x427   :  { %v1019_v38 = vsub.f32 %v930_v35, %v1018_v37  ;;  %v911_v39 = vpop.trf.xlu0  ;;  %v1011_v40 = vsub.f32 %v1009_v33, %v1010_v36 }
 0x428   :  { %v933_v41 = vsel %vm925_vm4, %v911_v39, 0 }
 0x429   :  { %v1020_v42 = vand.u32 4294901760, %v1019_v38  ;;  %v1028_v43 = vand.u32 4294901760, %v933_v41  ;;  %v1012_v44 = vand.u32 4294901760, %v1011_v40 }
 0x42b   :  { %v1021_v45 = vsub.f32 %v1019_v38, %v1020_v42  ;;  %v1029_v47 = vsub.f32 %v933_v41, %v1028_v43  ;;  %1898 = vmatprep.mubr.f32.mxu1 %v1012_v44  ;;  %v912_v48 = vpop.trf.xlu0  ;;  %v1518_v41 = vld [vmem:[%s2700_s7 + $0x8] sm:$0xff] }
 0x42c   :  { %v936_v49 = vsel %vm925_vm4, %v912_v48, 0 }
 0x42d   :  { %v1022_v50 = vand.u32 4294901760, %v1021_v45  ;;  %v1030_v51 = vand.u32 4294901760, %v1029_v47  ;;  %v1038_v52 = vand.u32 4294901760, %v936_v49  ;;  %v1680_v45 = vmul.f32 -1.442695, %v2585_v4 }
 0x42f   :  { %v1039_v53 = vsub.f32 %v936_v49, %v1038_v52  ;;  %1899 = vmatmul.mubr.f32.vlgmr.msra.gmra.mrb[2].mxu1 %v1022_v50  ;;  %v1031_v54 = vsub.f32 %v1029_v47, %v1030_v51 }
 0x430   :  { %1905 = vmatpush3.msra.mxu1 %v1053_v29 }
 0x431   :  { %v1040_v55 = vand.u32 4294901760, %v1039_v53  ;;  %v1032_v57 = vand.u32 4294901760, %v1031_v54  ;;  %1912 = vmatprep.subr.mxu1 %v1050_v26 }
 0x433   :  { %1901 = vmatprep.mubr.f32.mxu1 %v1032_v57  ;;  %v1041_v58 = vsub.f32 %v1039_v53, %v1040_v55 }
 0x435   :  { %v1042_v59 = vand.u32 4294901760, %v1041_v58 }
 0x437   :  { %1902 = vmatmul.mubr.f32.gmra.mrb[4].mxu1 %v1042_v59 }
 0x438   :  { %1906 = vmatprep.mubr.f32.mxu1 %v1008_v32 }
 0x43b   :  { %1907 = vmatmul.mubr.f32.vlgmr.msra.gmra.mrb[2].mxu1 %v1018_v37 }
 0x43c   :  { %1913 = vmatpush3.msra.mxu1 %v1050_v26  ;;  %1909 = vmatprep.mubr.f32.mxu1 %v1028_v43  ;;  %v865_v26 = vrot.slane %v2474_v56, 3 }
 0x43d   :  { %1920 = vmatprep.subr.mxu1 %v2596_v24 }
 0x43f   :  { %1910 = vmatmul.mubr.f32.gmra.mrb[4].mxu1 %v1038_v52 }
 0x440   :  { %1914 = vmatprep.mubr.f32.mxu1 %v1009_v33 }
 0x443   :  { %1915 = vmatmul.mubr.f32.vlgmr.msra.gmra.mrb[2].mxu1 %v1019_v38 }
 0x444   :  { %1921 = vmatpush3.msra.mxu1 %v2596_v24  ;;  %1917 = vmatprep.mubr.f32.mxu1 %v1029_v47 }
 0x445   :  { %1928 = vmatprep.subr.mxu1 %v1051_v27 }
 0x447   :  { %1918 = vmatmul.mubr.f32.gmra.mrb[4].mxu1 %v1039_v53 }
 0x448   :  { %1922 = vmatprep.mubr.f32.mxu1 %v1010_v36 }
 0x44b   :  { %1923 = vmatmul.mubr.f32.vlgmr.msra.gmra.mrb[2].mxu1 %v1020_v42  ;;  %v1517_v42 = vld [vmem:[%s2700_s7] sm:$0xff] }
 0x44c   :  { %1929 = vmatpush3.msra.mxu1 %v1051_v27  ;;  %1925 = vmatprep.mubr.f32.mxu1 %v1030_v51  ;;  %v867_v27 = vadd.f32 %v865_v26, %v2590_v20 }
 0x44d   :  { %1936 = vmatprep.subr.mxu1 %v2596_v24 }
 0x44e   :  { %v871_v28 = vand.u32 2147483647, %v867_v27  ;;  %v868_v38 = vmax.f32 %v867_v27, 0.0  ;;  %vm869_vm6 = vcmp.ne.f32.partialorder %v867_v27, %v867_v27 }
 0x44f   :  { %1926 = vmatmul.mubr.f32.gmra.mrb[4].mxu1 %v1040_v55  ;;  %v33_v55 = vld [vmem:[%s2708_s3] sm:$0xff] }
 0x450   :  { %1930 = vmatprep.mubr.f32.mxu1 %v1008_v32  ;;  %v872_v29 = vsub.f32 0.0, %v871_v28 }
 0x452   :  { %v873_v30 = vmul.f32 1.442695, %v872_v29 }
 0x453   :  { %1931 = vmatmul.mubr.f32.vlgmr.msra.gmra.mrb[2].mxu1 %v1018_v37 }
 0x454   :  { %1937 = vmatpush3.msra.mxu1 %v2596_v24  ;;  %1933 = vmatprep.mubr.f32.mxu1 %v1028_v43  ;;  %v1660_v24 = vrot.slane %v2277_v22, %v2287_v25  ;;  %2165 = vpow2.f32 %v873_v30 }
 0x455   :  { %2099 = vmatprep.subr.bf16.mxu1 %v2177_v1 }
 0x456   :  { %1661 = vrot.lane.b32.xlu1 %v1660_v24, %s2182_s28 }
 0x457   :  { %1934 = vmatmul.mubr.f32.gmra.mrb[4].mxu1 %v1038_v52 }
 0x458   :  { %1938 = vmatprep.mubr.f32.mxu1 %v1008_v32 }
 0x45b   :  { %1939 = vmatmul.mubr.f32.vlgmr.msra.gmra.mrb[2].mxu1 %v1018_v37 }
 0x45c   :  { %1941 = vmatprep.mubr.f32.mxu1 %v1028_v43  ;;  %2101 = vmatpush3.bf16.msra.mxu1 %v2100_v62 }
 0x45d   :  { %2102 = vmatprep.subr.bf16.mxu1 %v2177_v1 }
 0x45e   :  { %v2166_v31 = vpop.eup %2165 }
 0x45f   :  { %1942 = vmatmul.mubr.f32.gmra.mrb[4].mxu1 %v1038_v52  ;;  %v875_v32 = vadd.f32 1.0, %v2166_v31  ;;  %v878_v33 = vmul.f32 -0.5, %v2166_v31  ;;  %v881_v35 = vand.u32 2147483647, %v2166_v31  ;;  %v34_v52 = vld [vmem:[%s2708_s3 + $0x8] sm:$0xff] }
 0x460   :  { %1976 = vmatprep.mubr.msk.f32.mxu1 %vm2178_vm0, %v2179_v5  ;;  %2104 = vmatpush3.bf16.msra.mxu1 %v2103_v2  ;;  %v1572_v5 = vld [vmem:[%s2707_s6 + $0x28] sm:$0xff] }
 0x461   :  { %2105 = vmatprep.subr.bf16.mxu1 %v2177_v1  ;;  %v2106_v6 = vpack.c.bf16 %v1572_v5, %v1571_v3  ;;  %2167 = vlog2.f32 %v875_v32  ;;  %v879_v34 = vadd.f32 1.0, %v878_v33  ;;  %vm882_vm5 = vcmp.lt.f32.partialorder %v881_v35, 0.0004427343 }
 0x462   :  { %2169 = vpow2.f32 %v1680_v45 }
 0x463   :  { %v880_v37 = vmul.f32 %v2166_v31, %v879_v34 }
 0x464   :  { %2107 = vmatpush3.bf16.msra.mxu1 %v2106_v6 }
 0x465   :  { %2108 = vmatprep.subr.bf16.mxu1 %v2177_v1 }
 0x468   :  { %2110 = vmatpush3.bf16.msra.mxu1 %v2109_v8 }
 0x469   :  { %2111 = vmatprep.subr.bf16.mxu1 %v2177_v1 }
 0x46c   :  { %2113 = vmatpush3.bf16.msra.mxu1 %v2112_v11  ;;  %v1552_v11 = vrot.slane %v2587_v16, 4 }
 0x46d   :  { %2114 = vmatprep.subr.bf16.mxu1 %v2177_v1 }
 0x46e   :  { %v1554_v21 = vmul.f32 %v1552_v11, %v2474_v56 }
 0x470   :  { %2116 = vmatpush3.bf16.msra.mxu1 %v2115_v15 }
 0x471   :  { %2117 = vmatprep.subr.bf16.mxu1 %v2177_v1 }
 0x474   :  { %2119 = vmatpush3.bf16.msra.mxu1 %v2118_v18 }
 0x475   :  { %2120 = vmatprep.subr.bf16.mxu1 %v2177_v1  ;;  %v2168_v1 = vpop.eup %2167 }
 0x476   :  { %v877_v36 = vmul.f32 0.6931472, %v2168_v1  ;;  %v2170_v50 = vpop.eup %2169 }
 0x477   :  { %v1559_v58 = vadd.f32 1.0, %v2170_v50 }
 0x478   :  { %2122 = vmatpush3.bf16.msra.mxu1 %v2121_v23  ;;  %v883_v22 = vsel %vm882_vm5, %v880_v37, %v877_v36 }
 0x479   :  { %v884_v39 = vadd.f32 %v883_v22, %v868_v38 }
 0x47b   :  { %v885_v40 = vsel %vm869_vm6, %v867_v27, %v884_v39 }
 0x47c   :  { %v1522_v20 = vrot.slane %v885_v40, %v2287_v25  ;;  %v1531_v49 = vmul.f32 %v885_v40, %v2587_v16 }
 0x47e   :  { %v1524_v43 = vmul.f32 %v1522_v20, %v1518_v41  ;;  %v1523_v44 = vmul.f32 %v1522_v20, %v1517_v42  ;;  %v1535_v54 = vrot.slane %v1531_v49, %v2287_v25 }
 0x480   :  { %v1527_v47 = vmul.f32 1.442695, %v1524_v43  ;;  %v1525_v48 = vmul.f32 1.442695, %v1523_v44 }
 0x482   :  { %2171 = vpow2.f32 %v1527_v47 }
 0x483   :  { %2173 = vpow2.f32 %v1525_v48 }
 0x484   :  { %2175 = vrcp.f32 %v1559_v58 }
 0x48c   :  { %v2172_v51 = vpop.eup %2171 }
 0x48d   :  { %v2174_v53 = vpop.eup %2173  ;;  %v1530_v61 = vmul.f32 %v2172_v51, %v34_v52 }
 0x48e   :  { %v1529_v63 = vmul.f32 %v2174_v53, %v33_v55  ;;  %v2176_v10 = vpop.eup %2175 }
 0x48f   :  { %v1562_v12 = vmul.f32 %v2176_v10, %v2585_v4 }
 0x491   :  { %v1564_v18 = vrot.slane %v1562_v12, 4 }
 0x4c8   :  { %v1662_v24 = vpop.permute.xlu1 %1661 }
 0x52e   :  { %v1940_v57 = vpop.f32.mrb[2].mxu1 }
 0x52f   :  { %v1537_v59 = vmul.f32 %v1940_v57, %v1535_v54  ;;  %v1495_v60 = vpop.f32.mrb[3].mxu1 }
 0x530   :  { %v1536_v62 = vmul.f32 %v1535_v54, %v1495_v60 }
 0x531   :  { %v1539_v0 = vadd.f32 %v1537_v59, %v1530_v61 }
 0x532   :  { %v1943_v2 = vpop.f32.mrb[4].mxu1  ;;  %v1538_v3 = vadd.f32 %v1536_v62, %v1529_v63 }
 0x533   :  { %1541 = vst [vmem:[%s2709_s10 + $0x8] sm:$0xff] %v1539_v0  ;;  %v1543_v25 = vmul.f32 %v1943_v2, %v1539_v0  ;;  %v1507_v5 = vpop.f32.mrb[5].mxu1 }
 0x534   :  { %1540 = vst [vmem:[%s2709_s10] sm:$0xff] %v1538_v3  ;;  %v1542_v6 = vmul.f32 %v1538_v3, %v1507_v5 }
 0x536   :  { %v1544_v13 = vadd.f32 %v1543_v25, %v1542_v6 }
 0x538   :  { %v1545_v7 = vrot.slane %v1544_v13, 4 }
 0x53a   :  { %v1546_v8 = vadd.f32 %v1545_v7, %v1544_v13 }
 0x53c   :  { %v1547_v9 = vrot.slane %v1546_v8, 2 }
 0x53e   :  { %v1548_v46 = vadd.f32 %v1547_v9, %v1546_v8 }
 0x540   :  { %v1549_v15 = vrot.slane %v1548_v46, 1 }
 0x542   :  { %v1550_v17 = vadd.f32 %v1549_v15, %v1548_v46 }
 0x544   :  { %v1555_v14 = vadd.f32 %v1554_v21, %v1550_v17 }
 0x546   :  { %v1566_v19 = vmul.f32 %v1564_v18, %v1555_v14 }
 0x548   :  { %v1584_v23 = vrot.slane %v1566_v19, 4 }
 0x54a   :  { %1977 = vmatmul.mubr.f32.vlgmr.msra.gmra.mrb[6].mxu1 %v1584_v23 }
 0x61d   :  { %v1652_v26 = vpop.f32.mrb[6].mxu1 }
 0x61e   :  { %v1664_v27 = vsel %vm56_vm2, %v1652_v26, %v1662_v24  ;;  %v1978_v28 = vpop.f32.mrb[7].mxu1 }
 0x61f   :  { %1665 = vst [vmem:[%s2710_s8] sm:$0x1] %v1664_v27 }

</bundles_post_ra>
